<compile_context>
chip_gen: v6e
topology: v6e:2x2x1
jax: 0.10.0
libtpu: 0.0.40
codegen_flags: <defaults>
</compile_context>

<pallas_src>
import jax
import jax.numpy as jnp
from jax.experimental import pallas as pl
from jax.experimental.pallas import tpu as pltpu


def _round_up(a, b):
    return (a + b - 1) // b * b


def mlp_kernel(x_ref, w1_ref, b1_ref, w2_ref, b2_ref, w3_ref, b3_ref, o_ref):
    # Cast the f32 activation tile to the MXU input dtype in-kernel (avoids a
    # separate XLA convert pass over x in HBM).
    x = x_ref[...].astype(w1_ref.dtype)

    # Layer 1: Linear + ReLU (bf16 MXU, f32 accumulate, f32 epilogue).
    h1 = jnp.dot(x, w1_ref[...], preferred_element_type=jnp.float32)
    h1 = jnp.maximum(h1 + b1_ref[...], 0.0)

    # Layer 2: Linear + ReLU.
    h2 = jnp.dot(h1.astype(w2_ref.dtype), w2_ref[...],
                 preferred_element_type=jnp.float32)
    h2 = jnp.maximum(h2 + b2_ref[...], 0.0)

    # Layer 3: Linear (no activation).  Output block is exactly output_dim wide
    # (no pad) so HBM writeback is minimal.
    out = jnp.dot(h2.astype(w3_ref.dtype), w3_ref[...],
                  preferred_element_type=jnp.float32)
    o_ref[...] = (out + b3_ref[...]).astype(o_ref.dtype)
    # TODO(synk): if output_dim << 128 and the writeback stream ever dominates,
    # pack 128//output_dim logical rows per 128-lane row (in-kernel row-collapse
    # reshape) for lane-dense stores with zero pad waste.


def prepare_params(params, *, compute_dtype=jnp.bfloat16, hidden_multiple=128):
    """One-time parameter prep (do OUTSIDE the serving loop).

    Casts weights to the MXU input dtype and zero-pads the hidden width up to a
    lane-dense multiple (128): padded hidden units see zero weights and zero
    bias, so ReLU keeps them exactly 0 and they contribute nothing downstream.
    Biases stay f32 (f32 epilogue in the kernel).
    """
    w1, b1, w2, b2, w3, b3 = params
    h = w1.shape[1]
    hp = _round_up(h, hidden_multiple)
    if hp != h:
        p = hp - h
        w1 = jnp.pad(w1, ((0, 0), (0, p)))
        b1 = jnp.pad(b1, ((0, 0), (0, p)))
        w2 = jnp.pad(w2, ((0, p), (0, p)))
        b2 = jnp.pad(b2, ((0, 0), (0, p)))
        w3 = jnp.pad(w3, ((0, p), (0, 0)))
    return (w1.astype(compute_dtype), b1.astype(jnp.float32),
            w2.astype(compute_dtype), b2.astype(jnp.float32),
            w3.astype(compute_dtype), b3.astype(jnp.float32))


def neural_network_forward(x, prepared_params, *, block_batch=512):
    """Fused forward pass of the 3-layer MLP in one pallas_call.

    The batch is tiled over a 1-D grid (weights/biases use a constant index_map
    so they stay VMEM-resident and are DMA'd once); x tiles and output tiles
    are double-buffered by the Pallas pipeline.
    """
    w1, b1, w2, b2, w3, b3 = prepared_params
    batch, input_dim = x.shape
    assert input_dim == w1.shape[0]
    hidden_p = w1.shape[1]
    output_dim = w3.shape[1]

    # --- batch tile selection ------------------------------------------------
    # Multiple of 128 rows (packed bf16 vregs stay unmasked, DMA rows aligned);
    # a small batch collapses to a single whole-batch tile (grid of 1).
    tb = min(_round_up(block_batch, 128), _round_up(batch, 128))
    tiles = pl.cdiv(batch, tb)
    if tiles > 1 and tiles % 2 == 1 and tb % 256 == 0:
        tb //= 2  # even step count -> both v7x TensorCores get work
    m_pad = _round_up(batch, tb)
    xp = x if m_pad == batch else jnp.pad(x, ((0, m_pad - batch), (0, 0)))

    grid = (m_pad // tb,)

    # Weights & biases: same block every grid step -> resident in VMEM.
    resident = lambda a: pl.BlockSpec(a.shape, lambda i: (0,) * a.ndim)

    # Advisory cost estimate so XLA schedules/overlaps the call sensibly.
    param_bytes = sum(int(p.size) * p.dtype.itemsize
                      for p in (w1, b1, w2, b2, w3, b3))
    cost = pl.CostEstimate(
        flops=2 * m_pad * (input_dim * hidden_p
                           + hidden_p * hidden_p
                           + hidden_p * output_dim),
        transcendentals=0,
        bytes_accessed=(int(xp.size) * xp.dtype.itemsize
                        + param_bytes
                        + m_pad * output_dim * 4),
    )

    # VMEM budget per step is tiny (double-buffered x/out tiles + resident
    # weights + f32 intermediates ~ tb*(in + 2*hidden_p + out)*4 B); 32 MiB is
    # safe on every generation and gives headroom for large block_batch on v5e.
    out = pl.pallas_call(
        mlp_kernel,
        out_shape=jax.ShapeDtypeStruct((m_pad, output_dim), jnp.float32),
        grid=grid,
        in_specs=[
            pl.BlockSpec((tb, input_dim), lambda i: (i, 0)),   # x: batch-tiled
            resident(w1), resident(b1),
            resident(w2), resident(b2),
            resident(w3), resident(b3),
        ],
        out_specs=pl.BlockSpec((tb, output_dim), lambda i: (i, 0)),
        compiler_params=pltpu.CompilerParams(
            dimension_semantics=("parallel",),      # megacore sharding on v7x
            vmem_limit_bytes=32 * 1024 * 1024,
        ),
        cost_estimate=cost,
    )(xp, w1, b1, w2, b2, w3, b3)

    return out[:batch]


def init_params(key, input_dim, hidden_dim, output_dim):
    """Deterministic init mimicking nn.Linear's uniform(-1/sqrt(fan_in), +)."""
    ks = jax.random.split(key, 6)

    def linear(kw, kb, fan_in, fan_out):
        bound = 1.0 / jnp.sqrt(fan_in)
        w = jax.random.uniform(kw, (fan_in, fan_out), jnp.float32, -bound, bound)
        b = jax.random.uniform(kb, (1, fan_out), jnp.float32, -bound, bound)
        return w, b

    w1, b1 = linear(ks[0], ks[1], input_dim, hidden_dim)
    w2, b2 = linear(ks[2], ks[3], hidden_dim, hidden_dim)
    w3, b3 = linear(ks[4], ks[5], hidden_dim, output_dim)
    return (w1, b1, w2, b2, w3, b3)


if __name__ == "__main__":
    input_dim, hidden_dim, output_dim = 32, 64, 16
    batch = 256   # small test size -> single whole-batch tile (grid of 1)

    key = jax.random.PRNGKey(0)
    k_x, k_p = jax.random.split(key)
    x = jax.random.normal(k_x, (batch, input_dim), jnp.float32)
    params = init_params(k_p, input_dim, hidden_dim, output_dim)

    prepared = prepare_params(params)               # one-time prep (cast + pad)
    out = neural_network_forward(x, prepared)
    out = jax.block_until_ready(out)
    assert out.shape == (batch, output_dim)

    w1, b1, w2, b2, w3, b3 = params

    # Reference 1: same bf16 inputs + f32 accumulation (matches kernel path;
    # the zero hidden padding contributes exactly 0 to the f32 accumulators).
    bf = jnp.bfloat16
    ref = jnp.maximum(
        jnp.dot(x.astype(bf), w1.astype(bf),
                preferred_element_type=jnp.float32) + b1, 0.0)
    ref = jnp.maximum(
        jnp.dot(ref.astype(bf), w2.astype(bf),
                preferred_element_type=jnp.float32) + b2, 0.0)
    ref = jnp.dot(ref.astype(bf), w3.astype(bf),
                  preferred_element_type=jnp.float32) + b3
    assert jnp.allclose(out, ref, atol=2e-3, rtol=2e-3)

    # Reference 2: full f32 math (PyTorch-equivalent), loose tol for bf16 MXU.
    ref32 = jnp.maximum(x @ w1 + b1, 0.0)
    ref32 = jnp.maximum(ref32 @ w2 + b2, 0.0)
    ref32 = ref32 @ w3 + b3
    assert jnp.allclose(out, ref32, atol=7e-2, rtol=7e-2)

    print("KERNEL_OK")
</pallas_src>

<mosaic_0001>
module attributes {stable_mosaic.version = 11 : i64} {
  func.func @mlp_kernel(%arg0: i32, %arg1: memref<256x32xf32, #tpu.memory_space<vmem>>, %arg2: memref<32x128xbf16, #tpu.memory_space<vmem>>, %arg3: memref<1x128xf32, #tpu.memory_space<vmem>>, %arg4: memref<128x128xbf16, #tpu.memory_space<vmem>>, %arg5: memref<1x128xf32, #tpu.memory_space<vmem>>, %arg6: memref<128x16xbf16, #tpu.memory_space<vmem>>, %arg7: memref<1x16xf32, #tpu.memory_space<vmem>>, %arg8: memref<256x16xf32, #tpu.memory_space<vmem>>) attributes {dimension_semantics = [#tpu.dimension_semantics<parallel>], iteration_bounds = array<i64: 1>, scalar_prefetch = 0 : i64, scratch_operands = 0 : i64, tpu.core_type = #tpu.core_type<tc>, window_params = [{transform_indices = @transform_0, window_bounds = array<i64: 256, 32>}, {pipeline_mode = #tpu.pipeline_mode<synchronous>, transform_indices = @transform_1, window_bounds = array<i64: 32, 128>}, {pipeline_mode = #tpu.pipeline_mode<synchronous>, transform_indices = @transform_2, window_bounds = array<i64: 1, 128>}, {pipeline_mode = #tpu.pipeline_mode<synchronous>, transform_indices = @transform_3, window_bounds = array<i64: 128, 128>}, {pipeline_mode = #tpu.pipeline_mode<synchronous>, transform_indices = @transform_4, window_bounds = array<i64: 1, 128>}, {pipeline_mode = #tpu.pipeline_mode<synchronous>, transform_indices = @transform_5, window_bounds = array<i64: 128, 16>}, {pipeline_mode = #tpu.pipeline_mode<synchronous>, transform_indices = @transform_6, window_bounds = array<i64: 1, 16>}, {transform_indices = @transform_7, window_bounds = array<i64: 256, 16>}]} {
    %c0 = arith.constant 0 : index
    %c0_0 = arith.constant 0 : index
    %0 = vector.load %arg1[%c0, %c0_0] : memref<256x32xf32, #tpu.memory_space<vmem>>, vector<256x32xf32>
    %1 = arith.truncf %0 : vector<256x32xf32> to vector<256x32xbf16>
    %c0_1 = arith.constant 0 : index
    %c0_2 = arith.constant 0 : index
    %2 = vector.load %arg2[%c0_1, %c0_2] : memref<32x128xbf16, #tpu.memory_space<vmem>>, vector<32x128xbf16>
    %cst = arith.constant dense<0.000000e+00> : vector<256x128xf32>
    %3 = tpu.matmul %1, %2, %cst {dimension_numbers = #tpu.dot_dimension_numbers<[1], [0], [0], [1], [0, 0, 1, 1], [], []>} : vector<256x32xbf16>, vector<32x128xbf16>, vector<256x128xf32> -> vector<256x128xf32>
    %c0_3 = arith.constant 0 : index
    %c0_4 = arith.constant 0 : index
    %4 = vector.load %arg3[%c0_3, %c0_4] : memref<1x128xf32, #tpu.memory_space<vmem>>, vector<1x128xf32>
    %5 = vector.broadcast %4 : vector<1x128xf32> to vector<256x128xf32>
    %6 = arith.addf %3, %5 : vector<256x128xf32>
    %cst_5 = arith.constant 0.000000e+00 : f32
    %7 = vector.broadcast %cst_5 : f32 to vector<256x128xf32>
    %8 = arith.maximumf %6, %7 : vector<256x128xf32>
    %9 = arith.truncf %8 : vector<256x128xf32> to vector<256x128xbf16>
    %c0_6 = arith.constant 0 : index
    %c0_7 = arith.constant 0 : index
    %10 = vector.load %arg4[%c0_6, %c0_7] : memref<128x128xbf16, #tpu.memory_space<vmem>>, vector<128x128xbf16>
    %cst_8 = arith.constant dense<0.000000e+00> : vector<256x128xf32>
    %11 = tpu.matmul %9, %10, %cst_8 {dimension_numbers = #tpu.dot_dimension_numbers<[1], [0], [0], [1], [0, 0, 1, 1], [], []>} : vector<256x128xbf16>, vector<128x128xbf16>, vector<256x128xf32> -> vector<256x128xf32>
    %c0_9 = arith.constant 0 : index
    %c0_10 = arith.constant 0 : index
    %12 = vector.load %arg5[%c0_9, %c0_10] : memref<1x128xf32, #tpu.memory_space<vmem>>, vector<1x128xf32>
    %13 = vector.broadcast %12 : vector<1x128xf32> to vector<256x128xf32>
    %14 = arith.addf %11, %13 : vector<256x128xf32>
    %cst_11 = arith.constant 0.000000e+00 : f32
    %15 = vector.broadcast %cst_11 : f32 to vector<256x128xf32>
    %16 = arith.maximumf %14, %15 : vector<256x128xf32>
    %17 = arith.truncf %16 : vector<256x128xf32> to vector<256x128xbf16>
    %c0_12 = arith.constant 0 : index
    %c0_13 = arith.constant 0 : index
    %18 = vector.load %arg6[%c0_12, %c0_13] : memref<128x16xbf16, #tpu.memory_space<vmem>>, vector<128x16xbf16>
    %cst_14 = arith.constant dense<0.000000e+00> : vector<256x16xf32>
    %19 = tpu.matmul %17, %18, %cst_14 {dimension_numbers = #tpu.dot_dimension_numbers<[1], [0], [0], [1], [0, 0, 1, 1], [], []>} : vector<256x128xbf16>, vector<128x16xbf16>, vector<256x16xf32> -> vector<256x16xf32>
    %c0_15 = arith.constant 0 : index
    %c0_16 = arith.constant 0 : index
    %20 = vector.load %arg7[%c0_15, %c0_16] : memref<1x16xf32, #tpu.memory_space<vmem>>, vector<1x16xf32>
    %21 = vector.broadcast %20 : vector<1x16xf32> to vector<256x16xf32>
    %22 = arith.addf %19, %21 : vector<256x16xf32>
    %c0_17 = arith.constant 0 : index
    %c0_18 = arith.constant 0 : index
    %23 = vector.load %arg8[%c0_17, %c0_18] : memref<256x16xf32, #tpu.memory_space<vmem>>, vector<256x16xf32>
    tpu.vector_store %arg8[%c0_17, %c0_18], %22 {strides = array<i32>} : memref<256x16xf32, #tpu.memory_space<vmem>>, vector<256x16xf32>,
    return
  }
  func.func @transform_0(%arg0: i32) -> (i32, i32) {
    %c0_i32 = arith.constant 0 : i32
    %c0_i32_0 = arith.constant 0 : i32
    return %arg0, %c0_i32 : i32, i32
  }
  func.func @transform_1(%arg0: i32) -> (i32, i32) {
    %c0_i32 = arith.constant 0 : i32
    %c0_i32_0 = arith.constant 0 : i32
    %c0_i32_1 = arith.constant 0 : i32
    return %c0_i32, %c0_i32_0 : i32, i32
  }
  func.func @transform_2(%arg0: i32) -> (i32, i32) {
    %c0_i32 = arith.constant 0 : i32
    %c0_i32_0 = arith.constant 0 : i32
    %c0_i32_1 = arith.constant 0 : i32
    return %c0_i32, %c0_i32_0 : i32, i32
  }
  func.func @transform_3(%arg0: i32) -> (i32, i32) {
    %c0_i32 = arith.constant 0 : i32
    %c0_i32_0 = arith.constant 0 : i32
    %c0_i32_1 = arith.constant 0 : i32
    return %c0_i32, %c0_i32_0 : i32, i32
  }
  func.func @transform_4(%arg0: i32) -> (i32, i32) {
    %c0_i32 = arith.constant 0 : i32
    %c0_i32_0 = arith.constant 0 : i32
    %c0_i32_1 = arith.constant 0 : i32
    return %c0_i32, %c0_i32_0 : i32, i32
  }
  func.func @transform_5(%arg0: i32) -> (i32, i32) {
    %c0_i32 = arith.constant 0 : i32
    %c0_i32_0 = arith.constant 0 : i32
    %c0_i32_1 = arith.constant 0 : i32
    return %c0_i32, %c0_i32_0 : i32, i32
  }
  func.func @transform_6(%arg0: i32) -> (i32, i32) {
    %c0_i32 = arith.constant 0 : i32
    %c0_i32_0 = arith.constant 0 : i32
    %c0_i32_1 = arith.constant 0 : i32
    return %c0_i32, %c0_i32_0 : i32, i32
  }
  func.func @transform_7(%arg0: i32) -> (i32, i32) {
    %c0_i32 = arith.constant 0 : i32
    %c0_i32_0 = arith.constant 0 : i32
    return %arg0, %c0_i32 : i32, i32
  }
}

</mosaic_0001>

<bundles_post_ra>
// kernel: tpu_custom_call.1
= control target key start
LH: loop header
LB: loop body
LE: loop exit
PB: predicated region body
PF: predicated region fallthrough
CT: control target
= control target key end

     0   :  { %vm98_vm0 = vcmask 261120   ;;  %vm868_vm1 = vcmask 130048   ;;  %s1622_s1 = inlined_call_operand.vmem [shape: bf16[32,128], index: 1, kind: input, shape index: {}]   ;;  %s1623_s0 = inlined_call_operand.vmem [shape: f32[256,32], index: 0, kind: input, shape index: {}]   ;;  %s1624_s3 = inlined_call_operand.vmem [shape: bf16[128,128], index: 3, kind: input, shape index: {}]   ;;  %s1625_s5 = inlined_call_operand.vmem [shape: bf16[128,16], index: 5, kind: input, shape index: {}]   ;;  %s1626_s2 = inlined_call_operand.vmem [shape: f32[1,128], index: 2, kind: input, shape index: {}]   ;;  %s1627_s4 = inlined_call_operand.vmem [shape: f32[1,128], index: 4, kind: input, shape index: {}]   ;;  %s1628_s6 = inlined_call_operand.vmem [shape: f32[1,16], index: 6, kind: input, shape index: {}]   ;;  %s1629_s7 = inlined_call_operand.vmem [shape: f32[256,16], index: 7, kind: output, shape index: {}]  }
   0x1   :  { %v1144_v0 = vld [vmem:[%s1622_s1 + $0x8] sm:$0xff]   ;;  %v1145_v1 = vld [vmem:[%s1622_s1] sm:$0xff]   ;;  %v29_v5 = vld [vmem:[%s1623_s0 + $0x10] sm:$0xff] }
   0x2   :  { %1008 = vmatprep.subr.bf16.mxu0 %v1144_v0  ;;  %v27_v2 = vld [vmem:[%s1623_s0] sm:$0xff]  ;;  %v28_v3 = vld [vmem:[%s1623_s0 + $0x8] sm:$0xff]  ;;  %1140 = vmatprep.subr.bf16.mxu1 %v1144_v0  ;;  %v30_v6 = vld [vmem:[%s1623_s0 + $0x18] sm:$0xff] }
   0x3   :  { %1009 = vmatpush3.bf16.msra.mxu0 %v1144_v0  ;;  %v59_v4 = vpack.c.bf16 %v28_v3, %v27_v2  ;;  %1142 = vmatpush3.bf16.msra.mxu1 %v1144_v0  ;;  %v31_v7 = vld [vmem:[%s1623_s0 + $0x20] sm:$0xff]  ;;  %v32_v8 = vld [vmem:[%s1623_s0 + $0x28] sm:$0xff]  ;;  %v60_v9 = vpack.c.bf16 %v30_v6, %v29_v5  ;;  %v45_v14 = vld [vmem:[%s1623_s0 + $0x90] sm:$0xff] }
   0x4   :  { %1010 = vmatprep.subr.bf16.mxu0 %v1145_v1  ;;  %1141 = vmatprep.subr.bf16.mxu1 %v1145_v1  ;;  %v61_v10 = vpack.c.bf16 %v32_v8, %v31_v7  ;;  %v43_v11 = vld [vmem:[%s1623_s0 + $0x80] sm:$0xff]  ;;  %v44_v12 = vld [vmem:[%s1623_s0 + $0x88] sm:$0xff]  ;;  %v46_v15 = vld [vmem:[%s1623_s0 + $0x98] sm:$0xff] }
   0x5   :  { %1012 = vmatprep.mubr.msk.bf16.mxu0 %vm98_vm0, %v59_v4  ;;  %v67_v13 = vpack.c.bf16 %v44_v12, %v43_v11  ;;  %v47_v16 = vld [vmem:[%s1623_s0 + $0xa0] sm:$0xff]  ;;  %v68_v17 = vpack.c.bf16 %v46_v15, %v45_v14  ;;  %v48_v18 = vld [vmem:[%s1623_s0 + $0xa8] sm:$0xff]  ;;  %v33_v19 = vld [vmem:[%s1623_s0 + $0x30] sm:$0xff] }
   0x6   :  { %v34_v20 = vld [vmem:[%s1623_s0 + $0x38] sm:$0xff]  ;;  %v35_v21 = vld [vmem:[%s1623_s0 + $0x40] sm:$0xff]  ;;  %v69_v22 = vpack.c.bf16 %v48_v18, %v47_v16  ;;  %v36_v23 = vld [vmem:[%s1623_s0 + $0x48] sm:$0xff] }
   0x7   :  { %1011 = vmatpush3.bf16.msra.mxu0 %v1145_v1  ;;  %1143 = vmatpush3.bf16.msra.mxu1 %v1145_v1  ;;  %v49_v24 = vld [vmem:[%s1623_s0 + $0xb0] sm:$0xff]  ;;  %v50_v25 = vld [vmem:[%s1623_s0 + $0xb8] sm:$0xff]  ;;  %v51_v26 = vld [vmem:[%s1623_s0 + $0xc0] sm:$0xff]  ;;  %v62_v29 = vpack.c.bf16 %v34_v20, %v33_v19  ;;  %v63_v31 = vpack.c.bf16 %v36_v23, %v35_v21 }
   0x8   :  { %1028 = vmatprep.mubr.msk.bf16.mxu1 %vm98_vm0, %v67_v13  ;;  %v52_v27 = vld [vmem:[%s1623_s0 + $0xc8] sm:$0xff]  ;;  %v1146_v28 = vld [vmem:[%s1624_s3 + $0x38] sm:$0xff]   ;;  %v1147_v30 = vld [vmem:[%s1624_s3 + $0x30] sm:$0xff]   ;;  %v70_v32 = vpack.c.bf16 %v50_v25, %v49_v24 }
   0x9   :  { %1044 = vmatprep.subr.bf16.mxu1 %v1146_v28  ;;  %v71_v33 = vpack.c.bf16 %v52_v27, %v51_v26  ;;  %v37_v34 = vld [vmem:[%s1623_s0 + $0x50] sm:$0xff]  ;;  %v38_v35 = vld [vmem:[%s1623_s0 + $0x58] sm:$0xff]  ;;  %v1148_v36 = vld [vmem:[%s1624_s3 + $0x28] sm:$0xff]  }
   0xa   :  { %1013 = vmatmul.mubr.msk.bf16.vlgmr.msra.gmra.mxu0 %vm98_vm0, %v60_v9  ;;  %1029 = vmatmul.mubr.msk.bf16.vlgmr.msra.gmra.mxu1 %vm98_vm0, %v68_v17  ;;  %v39_v37 = vld [vmem:[%s1623_s0 + $0x60] sm:$0xff]  ;;  %v40_v38 = vld [vmem:[%s1623_s0 + $0x68] sm:$0xff]  ;;  %v53_v39 = vld [vmem:[%s1623_s0 + $0xd0] sm:$0xff]  ;;  %v64_v44 = vpack.c.bf16 %v38_v35, %v37_v34 }
   0xb   :  { %1016 = vmatprep.mubr.msk.bf16.mxu0 %vm98_vm0, %v61_v10  ;;  %1032 = vmatprep.mubr.msk.bf16.mxu1 %vm98_vm0, %v69_v22  ;;  %v54_v40 = vld [vmem:[%s1623_s0 + $0xd8] sm:$0xff]  ;;  %v55_v41 = vld [vmem:[%s1623_s0 + $0xe0] sm:$0xff]  ;;  %v56_v42 = vld [vmem:[%s1623_s0 + $0xe8] sm:$0xff]  ;;  %v65_v45 = vpack.c.bf16 %v40_v38, %v39_v37 }
   0xc   :  { %1045 = vmatpush3.bf16.msra.mxu1 %v1146_v28  ;;  %v1149_v43 = vld [vmem:[%s1624_s3 + $0x20] sm:$0xff]   ;;  %v72_v46 = vpack.c.bf16 %v54_v40, %v53_v39  ;;  %v73_v47 = vpack.c.bf16 %v56_v42, %v55_v41  ;;  %v1150_v48 = vld [vmem:[%s1624_s3 + $0x18] sm:$0xff]   ;;  %v41_v49 = vld [vmem:[%s1623_s0 + $0x70] sm:$0xff] }
   0xd   :  { %1046 = vmatprep.subr.bf16.mxu1 %v1147_v30  ;;  %v42_v50 = vld [vmem:[%s1623_s0 + $0x78] sm:$0xff]  ;;  %v57_v51 = vld [vmem:[%s1623_s0 + $0xf0] sm:$0xff]  ;;  %v1152_v56 = vld [vmem:[%s1624_s3 + $0x8] sm:$0xff]  }
   0xe   :  { %v58_v52 = vld [vmem:[%s1623_s0 + $0xf8] sm:$0xff]  ;;  %v66_v53 = vpack.c.bf16 %v42_v50, %v41_v49  ;;  %v1151_v55 = vld [vmem:[%s1624_s3 + $0x10] sm:$0xff]   ;;  %v1153_v57 = vld [vmem:[%s1624_s3] sm:$0xff]  }
   0xf   :  { %v74_v54 = vpack.c.bf16 %v58_v52, %v57_v51  ;;  %v1154_v58 = vld [vmem:[%s1625_s5 + $0x38] sm:$0xff]   ;;  %v1155_v59 = vld [vmem:[%s1625_s5 + $0x30] sm:$0xff]   ;;  %v1156_v60 = vld [vmem:[%s1625_s5 + $0x28] sm:$0xff]  }
  0x10   :  { %1047 = vmatpush3.bf16.msra.mxu1 %v1147_v30  ;;  %1092 = vmatprep.subr.bf16.mxu0 %v1154_v58  ;;  %v1157_v61 = vld [vmem:[%s1625_s5 + $0x20] sm:$0xff]   ;;  %v1158_v62 = vld [vmem:[%s1625_s5 + $0x18] sm:$0xff]  }
  0x11   :  { %1048 = vmatprep.subr.bf16.mxu1 %v1148_v36  ;;  %1093 = vmatpush3.bf16.msra.mxu0 %v1154_v58  ;;  %v1364_v2 = vld [vmem:[%s1626_s2] ss:$0 sm:$0xff] }
  0x12   :  { %1017 = vmatmul.mubr.msk.bf16.gmra.mxu0 %vm98_vm0, %v62_v29  ;;  %1033 = vmatmul.mubr.msk.bf16.gmra.mxu1 %vm98_vm0, %v70_v32 }
  0x13   :  { %1020 = vmatprep.mubr.msk.bf16.mxu0 %vm98_vm0, %v63_v31  ;;  %1036 = vmatprep.mubr.msk.bf16.mxu1 %vm98_vm0, %v71_v33 }
  0x14   :  { %1049 = vmatpush3.bf16.msra.mxu1 %v1148_v36  ;;  %1094 = vmatprep.subr.bf16.mxu0 %v1155_v59 }
  0x15   :  { %1050 = vmatprep.subr.bf16.mxu1 %v1149_v43  ;;  %1095 = vmatpush3.bf16.msra.mxu0 %v1155_v59 }
  0x16   :  { %1096 = vmatprep.subr.bf16.mxu0 %v1156_v60 }
  0x18   :  { %1051 = vmatpush3.bf16.msra.mxu1 %v1149_v43 }
  0x19   :  { %1052 = vmatprep.subr.bf16.mxu1 %v1150_v48  ;;  %1097 = vmatpush3.bf16.msra.mxu0 %v1156_v60 }
  0x1a   :  { %1021 = vmatmul.mubr.msk.bf16.gmra.mxu0 %vm98_vm0, %v64_v44  ;;  %1037 = vmatmul.mubr.msk.bf16.gmra.mxu1 %vm98_vm0, %v72_v46 }
  0x1b   :  { %1024 = vmatprep.mubr.msk.bf16.mxu0 %vm98_vm0, %v65_v45  ;;  %1040 = vmatprep.mubr.msk.bf16.mxu1 %vm98_vm0, %v73_v47 }
  0x1c   :  { %1053 = vmatpush3.bf16.msra.mxu1 %v1150_v48  ;;  %1098 = vmatprep.subr.bf16.mxu0 %v1157_v61 }
  0x1d   :  { %1054 = vmatprep.subr.bf16.mxu1 %v1151_v55  ;;  %1099 = vmatpush3.bf16.msra.mxu0 %v1157_v61 }
  0x1e   :  { %1100 = vmatprep.subr.bf16.mxu0 %v1158_v62 }
  0x20   :  { %1055 = vmatpush3.bf16.msra.mxu1 %v1151_v55 }
  0x21   :  { %1056 = vmatprep.subr.bf16.mxu1 %v1152_v56  ;;  %1101 = vmatpush3.bf16.msra.mxu0 %v1158_v62 }
  0x22   :  { %1025 = vmatmul.mubr.msk.bf16.gmra.mxu0 %vm98_vm0, %v66_v53  ;;  %1041 = vmatmul.mubr.msk.bf16.gmra.mxu1 %vm98_vm0, %v74_v54 }
  0x24   :  { %1057 = vmatpush3.bf16.msra.mxu1 %v1152_v56 }
  0x25   :  { %1058 = vmatprep.subr.bf16.mxu1 %v1153_v57 }
  0x28   :  { %1059 = vmatpush3.bf16.msra.mxu1 %v1153_v57 }
  0xca   :  { %v1014_v63 = vpop.f32.mrf.mxu0  ;;  %v1359_v0 = vpop.f32.mrf.mxu1 }
  0xcb   :  { %v190_v8 = vadd.f32 %v1014_v63, %v1364_v2 }
  0xcc   :  { %v181_v1 = vpop.f32.mrf.mxu0  ;;  %v245_v3 = vpop.f32.mrf.mxu1 }
  0xcd   :  { %v182_v5 = vadd.f32 %v1364_v2, %v181_v1  ;;  %v310_v17 = vmax.f32 %v190_v8, 0.0  ;;  %v246_v53 = vadd.f32 %v1364_v2, %v245_v3 }
  0xce   :  { %v1015_v4 = vpop.f32.mrf.mxu0  ;;  %v1368_v7 = vpop.f32.mrf.mxu1 }
  0xcf   :  { %v193_v6 = vadd.f32 %v1015_v4, %v1364_v2  ;;  %v308_v14 = vmax.f32 %v182_v5, 0.0  ;;  %v324_v62 = vmax.f32 %v246_v53, 0.0  ;;  %v1423_v53 = vld [vmem:[%s1627_s4] ss:$0 sm:$0xff] }
  0xd0   :  { %v184_v9 = vpop.f32.mrf.mxu0  ;;  %v248_v11 = vpop.f32.mrf.mxu1 }
  0xd1   :  { %v185_v10 = vadd.f32 %v1364_v2, %v184_v9  ;;  %v311_v12 = vmax.f32 %v193_v6, 0.0  ;;  %v249_v54 = vadd.f32 %v1364_v2, %v248_v11 }
  0xd2   :  { %v1018_v13 = vpop.f32.mrf.mxu0  ;;  %v1372_v16 = vpop.f32.mrf.mxu1 }
  0xd3   :  { %v309_v15 = vmax.f32 %v185_v10, 0.0  ;;  %v341_v21 = vpack.c.bf16 %v311_v12, %v310_v17  ;;  %v206_v26 = vadd.f32 %v1018_v13, %v1364_v2  ;;  %v325_v1 = vmax.f32 %v249_v54, 0.0 }
  0xd4   :  { %v197_v18 = vpop.f32.mrf.mxu0  ;;  %v261_v20 = vpop.f32.mrf.mxu1  ;;  %v254_v13 = vadd.f32 %v1359_v0, %v1364_v2  ;;  %v270_v0 = vadd.f32 %v1372_v16, %v1364_v2 }
  0xd5   :  { %v340_v19 = vpack.c.bf16 %v309_v15, %v308_v14  ;;  %v198_v23 = vadd.f32 %v1364_v2, %v197_v18  ;;  %v314_v34 = vmax.f32 %v206_v26, 0.0  ;;  %v348_v10 = vpack.c.bf16 %v325_v1, %v324_v62 }
  0xd6   :  { %v1019_v22 = vpop.f32.mrf.mxu0  ;;  %v1376_v25 = vpop.f32.mrf.mxu1  ;;  %v262_v11 = vadd.f32 %v1364_v2, %v261_v20  ;;  %v257_v15 = vadd.f32 %v1368_v7, %v1364_v2 }
  0xd7   :  { %v209_v24 = vadd.f32 %v1019_v22, %v1364_v2  ;;  %1060 = vmatprep.mubr.bf16.mxu1 %v340_v19  ;;  %v312_v32 = vmax.f32 %v198_v23, 0.0  ;;  %v273_v7 = vadd.f32 %v1376_v25, %v1364_v2 }
  0xd8   :  { %v200_v27 = vpop.f32.mrf.mxu0  ;;  %1061 = vmatmul.mubr.bf16.vlgmr.msra.gmra.mxu1 %v341_v21  ;;  %v264_v31 = vpop.f32.mrf.mxu1  ;;  %v328_v18 = vmax.f32 %v262_v11, 0.0  ;;  %v326_v21 = vmax.f32 %v254_v13, 0.0  ;;  %v327_v22 = vmax.f32 %v257_v15, 0.0 }
  0xd9   :  { %v201_v28 = vadd.f32 %v1364_v2, %v200_v27  ;;  %v315_v29 = vmax.f32 %v209_v24, 0.0  ;;  %v265_v12 = vadd.f32 %v1364_v2, %v264_v31  ;;  %v330_v31 = vmax.f32 %v270_v0, 0.0 }
  0xda   :  { %v1022_v30 = vpop.f32.mrf.mxu0  ;;  %v1380_v39 = vpop.f32.mrf.mxu1  ;;  %v349_v27 = vpack.c.bf16 %v327_v22, %v326_v21 }
  0xdb   :  { %v313_v33 = vmax.f32 %v201_v28, 0.0  ;;  %v343_v37 = vpack.c.bf16 %v315_v29, %v314_v34  ;;  %v222_v42 = vadd.f32 %v1022_v30, %v1364_v2  ;;  %v329_v19 = vmax.f32 %v265_v12, 0.0 }
  0xdc   :  { %v213_v35 = vpop.f32.mrf.mxu0  ;;  %v277_v47 = vpop.f32.mrf.mxu1  ;;  %v286_v16 = vadd.f32 %v1380_v39, %v1364_v2  ;;  %v1159_v39 = vld [vmem:[%s1625_s5 + $0x10] sm:$0xff]  }
  0xdd   :  { %v342_v36 = vpack.c.bf16 %v313_v33, %v312_v32  ;;  %v214_v40 = vadd.f32 %v1364_v2, %v213_v35  ;;  %v318_v50 = vmax.f32 %v222_v42, 0.0  ;;  %v350_v24 = vpack.c.bf16 %v329_v19, %v328_v18  ;;  %1102 = vmatprep.subr.bf16.mxu0 %v1159_v39 }
  0xde   :  { %v1023_v38 = vpop.f32.mrf.mxu0  ;;  %v1039_v57 = vpop.f32.mrf.mxu1  ;;  %v278_v20 = vadd.f32 %v1364_v2, %v277_v47  ;;  %v331_v32 = vmax.f32 %v273_v7, 0.0  ;;  %1103 = vmatpush3.bf16.msra.mxu0 %v1159_v39 }
  0xdf   :  { %v225_v41 = vadd.f32 %v1023_v38, %v1364_v2  ;;  %1064 = vmatprep.mubr.bf16.mxu1 %v342_v36  ;;  %v316_v48 = vmax.f32 %v214_v40, 0.0  ;;  %v289_v38 = vadd.f32 %v1039_v57, %v1364_v2 }
  0xe0   :  { %v216_v43 = vpop.f32.mrf.mxu0  ;;  %1065 = vmatmul.mubr.bf16.gmra.mxu1 %v343_v37  ;;  %v280_v3 = vpop.f32.mrf.mxu1  ;;  %v332_v29 = vmax.f32 %v278_v20, 0.0  ;;  %v351_v37 = vpack.c.bf16 %v331_v32, %v330_v31 }
  0xe1   :  { %v217_v44 = vadd.f32 %v1364_v2, %v216_v43  ;;  %v319_v45 = vmax.f32 %v225_v41, 0.0  ;;  %v281_v26 = vadd.f32 %v1364_v2, %v280_v3  ;;  %v334_v41 = vmax.f32 %v286_v16, 0.0 }
  0xe2   :  { %v1026_v46 = vpop.f32.mrf.mxu0  ;;  %v1042_v17 = vpop.f32.mrf.mxu1  ;;  %v335_v42 = vmax.f32 %v289_v38, 0.0 }
  0xe3   :  { %v317_v49 = vmax.f32 %v217_v44, 0.0  ;;  %v345_v55 = vpack.c.bf16 %v319_v45, %v318_v50  ;;  %v238_v60 = vadd.f32 %v1026_v46, %v1364_v2  ;;  %v333_v30 = vmax.f32 %v281_v26, 0.0  ;;  %v1160_v50 = vld [vmem:[%s1625_s5 + $0x8] sm:$0xff]  }
  0xe4   :  { %v229_v51 = vpop.f32.mrf.mxu0  ;;  %v293_v23 = vpop.f32.mrf.mxu1  ;;  %v353_v44 = vpack.c.bf16 %v335_v42, %v334_v41  ;;  %v302_v45 = vadd.f32 %v1042_v17, %v1364_v2  ;;  %1104 = vmatprep.subr.bf16.mxu0 %v1160_v50 }
  0xe5   :  { %v344_v52 = vpack.c.bf16 %v317_v49, %v316_v48  ;;  %v230_v58 = vadd.f32 %v1364_v2, %v229_v51  ;;  %v322_v8 = vmax.f32 %v238_v60, 0.0  ;;  %v352_v34 = vpack.c.bf16 %v333_v30, %v332_v29  ;;  %1105 = vmatpush3.bf16.msra.mxu0 %v1160_v50 }
  0xe6   :  { %v1027_v56 = vpop.f32.mrf.mxu0  ;;  %v1043_v28 = vpop.f32.mrf.mxu1  ;;  %v294_v35 = vadd.f32 %v1364_v2, %v293_v23  ;;  %v338_v47 = vmax.f32 %v302_v45, 0.0 }
  0xe7   :  { %v241_v59 = vadd.f32 %v1027_v56, %v1364_v2  ;;  %1068 = vmatprep.mubr.bf16.mxu1 %v344_v52  ;;  %v320_v5 = vmax.f32 %v230_v58, 0.0  ;;  %v305_v46 = vadd.f32 %v1043_v28, %v1364_v2 }
  0xe8   :  { %v232_v61 = vpop.f32.mrf.mxu0  ;;  %1069 = vmatmul.mubr.bf16.gmra.mxu1 %v345_v55  ;;  %v296_v33 = vpop.f32.mrf.mxu1  ;;  %v336_v25 = vmax.f32 %v294_v35, 0.0 }
  0xe9   :  { %v233_v63 = vadd.f32 %v1364_v2, %v232_v61  ;;  %v323_v4 = vmax.f32 %v241_v59, 0.0  ;;  %v297_v36 = vadd.f32 %v1364_v2, %v296_v33  ;;  %v339_v48 = vmax.f32 %v305_v46, 0.0  ;;  %v1161_v2 = vld [vmem:[%s1625_s5] sm:$0xff]  }
  0xea   :  { %1106 = vmatprep.subr.bf16.mxu0 %v1161_v2 }
  0xeb   :  { %v321_v6 = vmax.f32 %v233_v63, 0.0  ;;  %v347_v14 = vpack.c.bf16 %v323_v4, %v322_v8  ;;  %v337_v40 = vmax.f32 %v297_v36, 0.0  ;;  %v355_v49 = vpack.c.bf16 %v339_v48, %v338_v47  ;;  %1107 = vmatpush3.bf16.msra.mxu0 %v1161_v2 }
  0xed   :  { %v346_v9 = vpack.c.bf16 %v321_v6, %v320_v5  ;;  %v354_v43 = vpack.c.bf16 %v337_v40, %v336_v25 }
  0xef   :  { %1072 = vmatprep.mubr.bf16.mxu1 %v346_v9 }
  0xf0   :  { %1073 = vmatmul.mubr.bf16.gmra.mxu1 %v347_v14 }
  0xf1   :  { %1076 = vmatprep.mubr.bf16.mxu1 %v348_v10 }
  0xf8   :  { %1077 = vmatmul.mubr.bf16.gmra.mxu1 %v349_v27 }
  0xf9   :  { %1080 = vmatprep.mubr.bf16.mxu1 %v350_v24 }
 0x100   :  { %1081 = vmatmul.mubr.bf16.gmra.mxu1 %v351_v37 }
 0x101   :  { %1084 = vmatprep.mubr.bf16.mxu1 %v352_v34 }
 0x108   :  { %1085 = vmatmul.mubr.bf16.gmra.mxu1 %v353_v44 }
 0x109   :  { %1088 = vmatprep.mubr.bf16.mxu1 %v354_v43 }
 0x110   :  { %1089 = vmatmul.mubr.bf16.gmra.mxu1 %v355_v49 }
 0x198   :  { %v1062_v51 = vpop.f32.mrf.mxu1 }
 0x199   :  { %v470_v57 = vadd.f32 %v1062_v51, %v1423_v53 }
 0x19a   :  { %v461_v52 = vpop.f32.mrf.mxu1 }
 0x19b   :  { %v462_v55 = vadd.f32 %v1423_v53, %v461_v52  ;;  %v590_v1 = vmax.f32 %v470_v57, 0.0 }
 0x19c   :  { %v1063_v54 = vpop.f32.mrf.mxu1 }
 0x19d   :  { %v473_v56 = vadd.f32 %v1063_v54, %v1423_v53  ;;  %v588_v62 = vmax.f32 %v462_v55, 0.0 }
 0x19e   :  { %v464_v58 = vpop.f32.mrf.mxu1 }
 0x19f   :  { %v465_v59 = vadd.f32 %v1423_v53, %v464_v58  ;;  %v591_v60 = vmax.f32 %v473_v56, 0.0 }
 0x1a0   :  { %v1066_v61 = vpop.f32.mrf.mxu1 }
 0x1a1   :  { %v589_v63 = vmax.f32 %v465_v59, 0.0  ;;  %v621_v5 = vpack.c.bf16 %v591_v60, %v590_v1  ;;  %v486_v10 = vadd.f32 %v1066_v61, %v1423_v53 }
 0x1a2   :  { %v477_v4 = vpop.f32.mrf.mxu1 }
 0x1a3   :  { %v620_v3 = vpack.c.bf16 %v589_v63, %v588_v62  ;;  %v478_v8 = vadd.f32 %v1423_v53, %v477_v4  ;;  %v594_v18 = vmax.f32 %v486_v10, 0.0 }
 0x1a4   :  { %v1067_v6 = vpop.f32.mrf.mxu1 }
 0x1a5   :  { %v489_v9 = vadd.f32 %v1067_v6, %v1423_v53  ;;  %1108 = vmatprep.mubr.bf16.mxu0 %v620_v3  ;;  %v592_v15 = vmax.f32 %v478_v8, 0.0 }
 0x1a6   :  { %v480_v11 = vpop.f32.mrf.mxu1  ;;  %1109 = vmatmul.mubr.bf16.vlgmr.msra.gmra.mxu0 %v621_v5 }
 0x1a7   :  { %v481_v12 = vadd.f32 %v1423_v53, %v480_v11  ;;  %v595_v13 = vmax.f32 %v489_v9, 0.0 }
 0x1a8   :  { %v1070_v14 = vpop.f32.mrf.mxu1 }
 0x1a9   :  { %v593_v17 = vmax.f32 %v481_v12, 0.0  ;;  %v623_v22 = vpack.c.bf16 %v595_v13, %v594_v18  ;;  %v502_v26 = vadd.f32 %v1070_v14, %v1423_v53 }
 0x1aa   :  { %v493_v19 = vpop.f32.mrf.mxu1 }
 0x1ab   :  { %v622_v21 = vpack.c.bf16 %v593_v17, %v592_v15  ;;  %v494_v24 = vadd.f32 %v1423_v53, %v493_v19  ;;  %v598_v31 = vmax.f32 %v502_v26, 0.0 }
 0x1ac   :  { %v1071_v23 = vpop.f32.mrf.mxu1 }
 0x1ad   :  { %v505_v20 = vadd.f32 %v1071_v23, %v1423_v53  ;;  %1112 = vmatprep.mubr.bf16.mxu0 %v622_v21  ;;  %v596_v29 = vmax.f32 %v494_v24, 0.0 }
 0x1ae   :  { %v496_v27 = vpop.f32.mrf.mxu1  ;;  %1113 = vmatmul.mubr.bf16.gmra.mxu0 %v623_v22 }
 0x1af   :  { %v497_v0 = vadd.f32 %v1423_v53, %v496_v27  ;;  %v599_v7 = vmax.f32 %v505_v20, 0.0 }
 0x1b0   :  { %v1074_v28 = vpop.f32.mrf.mxu1 }
 0x1b1   :  { %v597_v30 = vmax.f32 %v497_v0, 0.0  ;;  %v625_v34 = vpack.c.bf16 %v599_v7, %v598_v31  ;;  %v518_v16 = vadd.f32 %v1074_v28, %v1423_v53 }
 0x1b2   :  { %v509_v32 = vpop.f32.mrf.mxu1 }
 0x1b3   :  { %v624_v33 = vpack.c.bf16 %v597_v30, %v596_v29  ;;  %v510_v36 = vadd.f32 %v1423_v53, %v509_v32  ;;  %v602_v44 = vmax.f32 %v518_v16, 0.0 }
 0x1b4   :  { %v1075_v35 = vpop.f32.mrf.mxu1 }
 0x1b5   :  { %v521_v37 = vadd.f32 %v1075_v35, %v1423_v53  ;;  %1116 = vmatprep.mubr.bf16.mxu0 %v624_v33  ;;  %v600_v42 = vmax.f32 %v510_v36, 0.0 }
 0x1b6   :  { %v512_v38 = vpop.f32.mrf.mxu1  ;;  %1117 = vmatmul.mubr.bf16.gmra.mxu0 %v625_v34 }
 0x1b7   :  { %v513_v25 = vadd.f32 %v1423_v53, %v512_v38  ;;  %v603_v40 = vmax.f32 %v521_v37, 0.0 }
 0x1b8   :  { %v1078_v41 = vpop.f32.mrf.mxu1 }
 0x1b9   :  { %v601_v43 = vmax.f32 %v513_v25, 0.0  ;;  %v627_v47 = vpack.c.bf16 %v603_v40, %v602_v44  ;;  %v534_v50 = vadd.f32 %v1078_v41, %v1423_v53  ;;  %v1460_v25 = vld [vmem:[%s1628_s6] ss:$0 sm:$0xff] }
 0x1ba   :  { %v525_v45 = vpop.f32.mrf.mxu1 }
 0x1bb   :  { %v626_v46 = vpack.c.bf16 %v601_v43, %v600_v42  ;;  %v526_v49 = vadd.f32 %v1423_v53, %v525_v45  ;;  %v606_v57 = vmax.f32 %v534_v50, 0.0 }
 0x1bc   :  { %v1079_v48 = vpop.f32.mrf.mxu1 }
 0x1bd   :  { %v537_v39 = vadd.f32 %v1079_v48, %v1423_v53  ;;  %1120 = vmatprep.mubr.bf16.mxu0 %v626_v46  ;;  %v604_v55 = vmax.f32 %v526_v49, 0.0 }
 0x1be   :  { %v528_v2 = vpop.f32.mrf.mxu1  ;;  %1121 = vmatmul.mubr.bf16.gmra.mxu0 %v627_v47 }
 0x1bf   :  { %v529_v51 = vadd.f32 %v1423_v53, %v528_v2  ;;  %v607_v52 = vmax.f32 %v537_v39, 0.0 }
 0x1c0   :  { %v1082_v54 = vpop.f32.mrf.mxu1 }
 0x1c1   :  { %v605_v56 = vmax.f32 %v529_v51, 0.0  ;;  %v629_v60 = vpack.c.bf16 %v607_v52, %v606_v57  ;;  %v550_v1 = vadd.f32 %v1082_v54, %v1423_v53 }
 0x1c2   :  { %v541_v58 = vpop.f32.mrf.mxu1 }
 0x1c3   :  { %v628_v59 = vpack.c.bf16 %v605_v56, %v604_v55  ;;  %v542_v62 = vadd.f32 %v1423_v53, %v541_v58  ;;  %v610_v10 = vmax.f32 %v550_v1, 0.0 }
 0x1c4   :  { %v1083_v61 = vpop.f32.mrf.mxu1 }
 0x1c5   :  { %v553_v63 = vadd.f32 %v1083_v61, %v1423_v53  ;;  %1124 = vmatprep.mubr.bf16.mxu0 %v628_v59  ;;  %v608_v8 = vmax.f32 %v542_v62, 0.0 }
 0x1c6   :  { %v544_v4 = vpop.f32.mrf.mxu1  ;;  %1125 = vmatmul.mubr.bf16.gmra.mxu0 %v629_v60 }
 0x1c7   :  { %v545_v3 = vadd.f32 %v1423_v53, %v544_v4  ;;  %v611_v5 = vmax.f32 %v553_v63, 0.0 }
 0x1c8   :  { %v1086_v6 = vpop.f32.mrf.mxu1 }
 0x1c9   :  { %v609_v9 = vmax.f32 %v545_v3, 0.0  ;;  %v631_v13 = vpack.c.bf16 %v611_v5, %v610_v10  ;;  %v566_v18 = vadd.f32 %v1086_v6, %v1423_v53 }
 0x1ca   :  { %v557_v11 = vpop.f32.mrf.mxu1 }
 0x1cb   :  { %v630_v12 = vpack.c.bf16 %v609_v9, %v608_v8  ;;  %v558_v15 = vadd.f32 %v1423_v53, %v557_v11  ;;  %v614_v26 = vmax.f32 %v566_v18, 0.0 }
 0x1cc   :  { %v1087_v14 = vpop.f32.mrf.mxu1 }
 0x1cd   :  { %v569_v17 = vadd.f32 %v1087_v14, %v1423_v53  ;;  %1128 = vmatprep.mubr.bf16.mxu0 %v630_v12  ;;  %v612_v24 = vmax.f32 %v558_v15, 0.0 }
 0x1ce   :  { %v560_v19 = vpop.f32.mrf.mxu1  ;;  %1129 = vmatmul.mubr.bf16.gmra.mxu0 %v631_v13 }
 0x1cf   :  { %v561_v21 = vadd.f32 %v1423_v53, %v560_v19  ;;  %v615_v22 = vmax.f32 %v569_v17, 0.0 }
 0x1d0   :  { %v1090_v23 = vpop.f32.mrf.mxu1 }
 0x1d1   :  { %v613_v20 = vmax.f32 %v561_v21, 0.0  ;;  %v633_v7 = vpack.c.bf16 %v615_v22, %v614_v26  ;;  %v582_v31 = vadd.f32 %v1090_v23, %v1423_v53 }
 0x1d2   :  { %v573_v27 = vpop.f32.mrf.mxu1 }
 0x1d3   :  { %v632_v0 = vpack.c.bf16 %v613_v20, %v612_v24  ;;  %v574_v29 = vadd.f32 %v1423_v53, %v573_v27  ;;  %v618_v37 = vmax.f32 %v582_v31, 0.0 }
 0x1d4   :  { %v1091_v28 = vpop.f32.mrf.mxu1 }
 0x1d5   :  { %v585_v30 = vadd.f32 %v1091_v28, %v1423_v53  ;;  %1132 = vmatprep.mubr.bf16.mxu0 %v632_v0  ;;  %v616_v35 = vmax.f32 %v574_v29, 0.0 }
 0x1d6   :  { %v576_v32 = vpop.f32.mrf.mxu1  ;;  %1133 = vmatmul.mubr.bf16.gmra.mxu0 %v633_v7 }
 0x1d7   :  { %v577_v33 = vadd.f32 %v1423_v53, %v576_v32  ;;  %v619_v34 = vmax.f32 %v585_v30, 0.0 }
 0x1d9   :  { %v617_v36 = vmax.f32 %v577_v33, 0.0  ;;  %v635_v38 = vpack.c.bf16 %v619_v34, %v618_v37 }
 0x1db   :  { %v634_v16 = vpack.c.bf16 %v617_v36, %v616_v35 }
 0x1dd   :  { %1136 = vmatprep.mubr.bf16.mxu0 %v634_v16 }
 0x1de   :  { %1137 = vmatmul.mubr.bf16.gmra.mxu0 %v635_v38 }
 0x266   :  { %v1110_v40 = vpop.f32.mrf.mxu0 }
 0x267   :  { %v750_v41 = vadd.f32 %v1110_v40, %v1460_v25 }
 0x268   :  { %v741_v42 = vpop.f32.mrf.mxu0 }
 0x269   :  { %871 = vst.msk [vmem:[%s1629_s7 + $0x10] sm:$0xff] %vm868_vm1, %v750_v41  ;;  %v742_v53 = vadd.f32 %v1460_v25, %v741_v42 }
 0x26a   :  { %v1111_v43 = vpop.f32.mrf.mxu0 }
 0x26b   :  { %869 = vst.msk [vmem:[%s1629_s7] sm:$0xff] %vm868_vm1, %v742_v53  ;;  %v753_v44 = vadd.f32 %v1111_v43, %v1460_v25 }
 0x26c   :  { %v744_v45 = vpop.f32.mrf.mxu0 }
 0x26d   :  { %872 = vst.msk [vmem:[%s1629_s7 + $0x18] sm:$0xff] %vm868_vm1, %v753_v44  ;;  %v745_v46 = vadd.f32 %v1460_v25, %v744_v45 }
 0x26e   :  { %v1114_v47 = vpop.f32.mrf.mxu0 }
 0x26f   :  { %870 = vst.msk [vmem:[%s1629_s7 + $0x8] sm:$0xff] %vm868_vm1, %v745_v46  ;;  %v766_v48 = vadd.f32 %v1114_v47, %v1460_v25 }
 0x270   :  { %v757_v49 = vpop.f32.mrf.mxu0 }
 0x271   :  { %875 = vst.msk [vmem:[%s1629_s7 + $0x30] sm:$0xff] %vm868_vm1, %v766_v48  ;;  %v758_v39 = vadd.f32 %v1460_v25, %v757_v49 }
 0x272   :  { %v1115_v50 = vpop.f32.mrf.mxu0 }
 0x273   :  { %873 = vst.msk [vmem:[%s1629_s7 + $0x20] sm:$0xff] %vm868_vm1, %v758_v39  ;;  %v769_v2 = vadd.f32 %v1115_v50, %v1460_v25 }
 0x274   :  { %v760_v51 = vpop.f32.mrf.mxu0 }
 0x275   :  { %876 = vst.msk [vmem:[%s1629_s7 + $0x38] sm:$0xff] %vm868_vm1, %v769_v2  ;;  %v761_v52 = vadd.f32 %v1460_v25, %v760_v51 }
 0x276   :  { %v1118_v54 = vpop.f32.mrf.mxu0 }
 0x277   :  { %874 = vst.msk [vmem:[%s1629_s7 + $0x28] sm:$0xff] %vm868_vm1, %v761_v52  ;;  %v782_v55 = vadd.f32 %v1118_v54, %v1460_v25 }
 0x278   :  { %v773_v56 = vpop.f32.mrf.mxu0 }
 0x279   :  { %879 = vst.msk [vmem:[%s1629_s7 + $0x50] sm:$0xff] %vm868_vm1, %v782_v55  ;;  %v774_v57 = vadd.f32 %v1460_v25, %v773_v56 }
 0x27a   :  { %v1119_v58 = vpop.f32.mrf.mxu0 }
 0x27b   :  { %877 = vst.msk [vmem:[%s1629_s7 + $0x40] sm:$0xff] %vm868_vm1, %v774_v57  ;;  %v785_v59 = vadd.f32 %v1119_v58, %v1460_v25 }
 0x27c   :  { %v776_v60 = vpop.f32.mrf.mxu0 }
 0x27d   :  { %880 = vst.msk [vmem:[%s1629_s7 + $0x58] sm:$0xff] %vm868_vm1, %v785_v59  ;;  %v777_v61 = vadd.f32 %v1460_v25, %v776_v60 }
 0x27e   :  { %v1122_v62 = vpop.f32.mrf.mxu0 }
 0x27f   :  { %878 = vst.msk [vmem:[%s1629_s7 + $0x48] sm:$0xff] %vm868_vm1, %v777_v61  ;;  %v798_v63 = vadd.f32 %v1122_v62, %v1460_v25 }
 0x280   :  { %v789_v1 = vpop.f32.mrf.mxu0 }
 0x281   :  { %883 = vst.msk [vmem:[%s1629_s7 + $0x70] sm:$0xff] %vm868_vm1, %v798_v63  ;;  %v790_v4 = vadd.f32 %v1460_v25, %v789_v1 }
 0x282   :  { %v1123_v3 = vpop.f32.mrf.mxu0 }
 0x283   :  { %881 = vst.msk [vmem:[%s1629_s7 + $0x60] sm:$0xff] %vm868_vm1, %v790_v4  ;;  %v801_v5 = vadd.f32 %v1123_v3, %v1460_v25 }
 0x284   :  { %v792_v6 = vpop.f32.mrf.mxu0 }
 0x285   :  { %884 = vst.msk [vmem:[%s1629_s7 + $0x78] sm:$0xff] %vm868_vm1, %v801_v5  ;;  %v793_v8 = vadd.f32 %v1460_v25, %v792_v6 }
 0x286   :  { %v1126_v9 = vpop.f32.mrf.mxu0 }
 0x287   :  { %882 = vst.msk [vmem:[%s1629_s7 + $0x68] sm:$0xff] %vm868_vm1, %v793_v8  ;;  %v814_v10 = vadd.f32 %v1126_v9, %v1460_v25 }
 0x288   :  { %v805_v11 = vpop.f32.mrf.mxu0 }
 0x289   :  { %887 = vst.msk [vmem:[%s1629_s7 + $0x90] sm:$0xff] %vm868_vm1, %v814_v10  ;;  %v806_v12 = vadd.f32 %v1460_v25, %v805_v11 }
 0x28a   :  { %v1127_v13 = vpop.f32.mrf.mxu0 }
 0x28b   :  { %885 = vst.msk [vmem:[%s1629_s7 + $0x80] sm:$0xff] %vm868_vm1, %v806_v12  ;;  %v817_v14 = vadd.f32 %v1127_v13, %v1460_v25 }
 0x28c   :  { %v808_v15 = vpop.f32.mrf.mxu0 }
 0x28d   :  { %888 = vst.msk [vmem:[%s1629_s7 + $0x98] sm:$0xff] %vm868_vm1, %v817_v14  ;;  %v809_v17 = vadd.f32 %v1460_v25, %v808_v15 }
 0x28e   :  { %v1130_v18 = vpop.f32.mrf.mxu0 }
 0x28f   :  { %886 = vst.msk [vmem:[%s1629_s7 + $0x88] sm:$0xff] %vm868_vm1, %v809_v17  ;;  %v830_v19 = vadd.f32 %v1130_v18, %v1460_v25 }
 0x290   :  { %v821_v21 = vpop.f32.mrf.mxu0 }
 0x291   :  { %891 = vst.msk [vmem:[%s1629_s7 + $0xb0] sm:$0xff] %vm868_vm1, %v830_v19  ;;  %v822_v22 = vadd.f32 %v1460_v25, %v821_v21 }
 0x292   :  { %v1131_v23 = vpop.f32.mrf.mxu0 }
 0x293   :  { %889 = vst.msk [vmem:[%s1629_s7 + $0xa0] sm:$0xff] %vm868_vm1, %v822_v22  ;;  %v833_v24 = vadd.f32 %v1131_v23, %v1460_v25 }
 0x294   :  { %v824_v20 = vpop.f32.mrf.mxu0 }
 0x295   :  { %892 = vst.msk [vmem:[%s1629_s7 + $0xb8] sm:$0xff] %vm868_vm1, %v833_v24  ;;  %v825_v26 = vadd.f32 %v1460_v25, %v824_v20 }
 0x296   :  { %v1134_v27 = vpop.f32.mrf.mxu0 }
 0x297   :  { %890 = vst.msk [vmem:[%s1629_s7 + $0xa8] sm:$0xff] %vm868_vm1, %v825_v26  ;;  %v846_v0 = vadd.f32 %v1134_v27, %v1460_v25 }
 0x298   :  { %v837_v7 = vpop.f32.mrf.mxu0 }
 0x299   :  { %895 = vst.msk [vmem:[%s1629_s7 + $0xd0] sm:$0xff] %vm868_vm1, %v846_v0  ;;  %v838_v28 = vadd.f32 %v1460_v25, %v837_v7 }
 0x29a   :  { %v1135_v29 = vpop.f32.mrf.mxu0 }
 0x29b   :  { %893 = vst.msk [vmem:[%s1629_s7 + $0xc0] sm:$0xff] %vm868_vm1, %v838_v28  ;;  %v849_v30 = vadd.f32 %v1135_v29, %v1460_v25 }
 0x29c   :  { %v840_v31 = vpop.f32.mrf.mxu0 }
 0x29d   :  { %896 = vst.msk [vmem:[%s1629_s7 + $0xd8] sm:$0xff] %vm868_vm1, %v849_v30  ;;  %v841_v32 = vadd.f32 %v1460_v25, %v840_v31 }
 0x29e   :  { %v1138_v33 = vpop.f32.mrf.mxu0 }
 0x29f   :  { %894 = vst.msk [vmem:[%s1629_s7 + $0xc8] sm:$0xff] %vm868_vm1, %v841_v32  ;;  %v862_v34 = vadd.f32 %v1138_v33, %v1460_v25 }
 0x2a0   :  { %v853_v35 = vpop.f32.mrf.mxu0 }
 0x2a1   :  { %899 = vst.msk [vmem:[%s1629_s7 + $0xf0] sm:$0xff] %vm868_vm1, %v862_v34  ;;  %v854_v36 = vadd.f32 %v1460_v25, %v853_v35 }
 0x2a2   :  { %v1139_v37 = vpop.f32.mrf.mxu0 }
 0x2a3   :  { %897 = vst.msk [vmem:[%s1629_s7 + $0xe0] sm:$0xff] %vm868_vm1, %v854_v36  ;;  %v865_v16 = vadd.f32 %v1139_v37, %v1460_v25 }
 0x2a4   :  { %v856_v38 = vpop.f32.mrf.mxu0 }
 0x2a5   :  { %900 = vst.msk [vmem:[%s1629_s7 + $0xf8] sm:$0xff] %vm868_vm1, %v865_v16  ;;  %v857_v40 = vadd.f32 %v1460_v25, %v856_v38 }
 0x2a7   :  { %898 = vst.msk [vmem:[%s1629_s7 + $0xe8] sm:$0xff] %vm868_vm1, %v857_v40 }

</bundles_post_ra>
